<compile_context>
chip_gen: v6e
topology: v6e:2x2x1
jax: 0.10.0
libtpu: 0.0.40
codegen_flags: <defaults>
</compile_context>

<pallas_src>
import jax
import jax.numpy as jnp
from jax.experimental import pallas as pl
from jax.experimental.pallas import tpu as pltpu


_LANE = 128
_SUB = 8


def _round_up(n, m):
    return ((n + m - 1) // m) * m


# --------------------------------------------------------------------------
# Kernels
# --------------------------------------------------------------------------
def _mlp_kernel_feat(x_ref,
                     w1_ref, b1_ref, s1_ref, t1_ref,
                     w3_ref, b3_ref,
                     w4_ref, b4_ref,
                     w5_ref, b5_ref,
                     slab_ref):
    """One batch tile; output slab packs [fc5 out | feature] on disjoint lanes."""
    xb = x_ref[...].astype(jnp.bfloat16)

    # fc1: real columns at [O, O+D) of the lane-dense slab; [0, O) are zero.
    h1 = jnp.dot(xb, w1_ref[...],
                 preferred_element_type=jnp.float32) + b1_ref[...]

    # batch_norm1 (eval-mode affine) on the f32 h1, then end h1's live range
    # by writing the feature columns into the output slab right away
    # (fc5 columns of h1 are exactly zero).
    h = h1 * s1_ref[...] + t1_ref[...]
    slab_ref[...] = h1.astype(slab_ref.dtype)

    # leaky_relu(0.01); dropout(p=0.3) is identity in eval mode.
    h = jnp.where(h > 0.0, h, 0.01 * h)
    # TODO(synk): training-mode dropout (pltpu.prng_* stochastic mask) omitted.

    # fc3 (batch_norm3 folded into weights/bias) + relu
    h = jnp.dot(h.astype(jnp.bfloat16), w3_ref[...],
                preferred_element_type=jnp.float32) + b3_ref[...]
    h = jnp.maximum(h, 0.0)

    # fc4 + relu
    h = jnp.dot(h.astype(jnp.bfloat16), w4_ref[...],
                preferred_element_type=jnp.float32) + b4_ref[...]
    h = jnp.maximum(h, 0.0)

    # fc5: real columns at [0, O), zero on the feature columns, so merging via
    # add leaves the already-stored feature columns untouched.
    out = jnp.dot(h.astype(jnp.bfloat16), w5_ref[...],
                  preferred_element_type=jnp.float32) + b5_ref[...]
    slab_ref[...] = slab_ref[...] + out.astype(slab_ref.dtype)


def _mlp_kernel_nofeat(x_ref,
                       w1_ref, b1_ref, s1_ref, t1_ref,
                       w3_ref, b3_ref,
                       w4_ref, b4_ref,
                       w5_ref, b5_ref,
                       out_ref):
    """Feature-free variant: only the fc5 columns are written back."""
    xb = x_ref[...].astype(jnp.bfloat16)
    h1 = jnp.dot(xb, w1_ref[...],
                 preferred_element_type=jnp.float32) + b1_ref[...]
    h = h1 * s1_ref[...] + t1_ref[...]
    h = jnp.where(h > 0.0, h, 0.01 * h)
    h = jnp.dot(h.astype(jnp.bfloat16), w3_ref[...],
                preferred_element_type=jnp.float32) + b3_ref[...]
    h = jnp.maximum(h, 0.0)
    h = jnp.dot(h.astype(jnp.bfloat16), w4_ref[...],
                preferred_element_type=jnp.float32) + b4_ref[...]
    h = jnp.maximum(h, 0.0)
    out = jnp.dot(h.astype(jnp.bfloat16), w5_ref[...],
                  preferred_element_type=jnp.float32) + b5_ref[...]
    out_ref[...] = out.astype(out_ref.dtype)


# --------------------------------------------------------------------------
# Host-side parameter preparation (fold BN3, pad to lane multiples, bf16)
# --------------------------------------------------------------------------
def prepare_params(raw, *, eps=1e-5):
    w1, b1 = raw["w1"], raw["b1"]          # (D, D),  (1, D)
    w3, b3 = raw["w3"], raw["b3"]          # (D, D2), (1, D2)
    w4, b4 = raw["w4"], raw["b4"]          # (D2,D4), (1, D4)
    w5, b5 = raw["w5"], raw["b5"]          # (D4, O), (1, O)
    D = int(w1.shape[0])
    D2 = int(w3.shape[1])
    D4 = int(w4.shape[1])
    O = int(w5.shape[1])

    def bn_affine(bn):
        scale = bn["gamma"] / jnp.sqrt(bn["running_var"] + eps)
        shift = bn["beta"] - bn["running_mean"] * scale
        return scale, shift

    s1, t1 = bn_affine(raw["bn1"])
    s3, t3 = bn_affine(raw["bn3"])

    # Fold BN3 into fc3.  BN1 stays separate because `feature` is the
    # un-normalized fc1 output.
    w3f = w3 * s3
    b3f = b3 * s3 + t3

    w_slab = _round_up(O + D, _LANE)       # width of fc1/fc5 outputs & slab
    w_out = _round_up(O, _LANE)            # feature-free output width
    w_h2 = _round_up(D2, _LANE)
    w_h4 = _round_up(D4, _LANE)

    def place(mat, rows, row_off, cols, col_off, out_rows, out_cols):
        buf = jnp.zeros((out_rows, out_cols), jnp.float32)
        return buf.at[row_off:row_off + rows, col_off:col_off + cols].set(mat)

    w1p = place(w1, D, 0, D, O, D, w_slab)
    b1p = place(b1, 1, 0, D, O, 1, w_slab)
    s1p = jnp.ones((1, w_slab), jnp.float32).at[:, O:O + D].set(s1)
    t1p = place(t1, 1, 0, D, O, 1, w_slab)
    w3p = place(w3f, D, O, D2, 0, w_slab, w_h2)
    b3p = place(b3f, 1, 0, D2, 0, 1, w_h2)
    w4p = place(w4, D2, 0, D4, 0, w_h2, w_h4)
    b4p = place(b4, 1, 0, D4, 0, 1, w_h4)
    w5p = place(w5, D4, 0, O, 0, w_h4, w_slab)     # packed-with-feature layout
    b5p = place(b5, 1, 0, O, 0, 1, w_slab)
    w5o = place(w5, D4, 0, O, 0, w_h4, w_out)      # feature-free layout
    b5o = place(b5, 1, 0, O, 0, 1, w_out)

    bf = jnp.bfloat16
    return dict(
        w1=w1p.astype(bf), b1=b1p, s1=s1p, t1=t1p,
        w3=w3p.astype(bf), b3=b3p,
        w4=w4p.astype(bf), b4=b4p,
        w5=w5p.astype(bf), b5=b5p,
        w5o=w5o.astype(bf), b5o=b5o,
        dims=(D, D2, D4, O, w_slab, w_out),
    )


# --------------------------------------------------------------------------
# VMEM budget / tile selection
# --------------------------------------------------------------------------
def _vmem_budget_bytes():
    cap = None
    try:
        cap = int(pltpu.get_tpu_info().vmem_capacity_bytes)
    except Exception:
        cap = None
    if not cap or cap <= 0:
        cap = 64 << 20  # conservative: v7x per-TensorCore VMEM
    # ~40 MiB on v7x (64 MiB), up to ~100 MiB on v5e/v6e (128 MiB).
    return int(min(cap * 0.65, 100 << 20))


def _choose_tb(B, block_b, tb_vmem_cap):
    b8 = _round_up(max(B, 1), _SUB)
    tb_cap = max(_SUB, min(_round_up(block_b, _SUB), tb_vmem_cap, b8))
    # v7x megacore: prefer >=2 grid steps when one tile would cover the batch
    # and splitting does not add meaningful padding (no effect on v5e/v6e).
    if b8 <= tb_cap and b8 >= 2 * _SUB:
        half = _round_up(-(-B // 2), _SUB)
        if 2 * half <= b8 + _SUB:
            tb_cap = min(tb_cap, half)
    # Largest multiple-of-8 tile whose zero-padding overhead is <= ~10%.
    tb = tb_cap
    while tb > _SUB:
        b_pad = _round_up(B, tb)
        if b_pad <= max(b8, int(1.10 * B)):
            return tb
        tb -= _SUB
    return _SUB


# --------------------------------------------------------------------------
# Wrapper
# --------------------------------------------------------------------------
def cmu_audio_forward(x, prep, *, block_b=4096, return_feature=True,
                      out_dtype=jnp.bfloat16, cast_x_to_bf16=True):
    """x: (B, D).  Returns (out, feature) like the PyTorch module (f32)."""
    D, D2, D4, O, w_slab, w_out = prep["dims"]
    B = int(x.shape[0])
    assert x.shape[1] == D

    # fc1's MXU operand is bf16 anyway; pre-casting halves the activation DMA.
    if cast_x_to_bf16 and x.dtype != jnp.bfloat16:
        x = x.astype(jnp.bfloat16)

    if return_feature:
        kernel = _mlp_kernel_feat
        out_w = w_slab
        w5, b5 = prep["w5"], prep["b5"]
    else:
        kernel = _mlp_kernel_nofeat
        out_w = w_out
        w5, b5 = prep["w5o"], prep["b5o"]

    weights = (prep["w1"], prep["b1"], prep["s1"], prep["t1"],
               prep["w3"], prep["b3"], prep["w4"], prep["b4"], w5, b5)
    weight_bytes = sum(int(a.size) * a.dtype.itemsize for a in weights)

    # Accurate per-row VMEM footprint: double-buffered x & output tiles plus
    # ~4 live f32 intermediates of the widest layer.
    w_h2 = _round_up(D2, _LANE)
    w_h4 = _round_up(D4, _LANE)
    max_w = max(out_w, w_slab, w_h2, w_h4, _round_up(D, _LANE))
    x_sz = jnp.dtype(x.dtype).itemsize
    out_sz = jnp.dtype(out_dtype).itemsize
    n_live = 4
    per_row = 2 * D * x_sz + 2 * out_w * out_sz + n_live * max_w * 4
    headroom = 2 << 20

    budget = _vmem_budget_bytes()
    avail = max(budget - 2 * weight_bytes - headroom, 0)
    tb_vmem_cap = max(_SUB, (avail // per_row) // _SUB * _SUB)

    tb = _choose_tb(B, block_b, tb_vmem_cap)
    b_pad = _round_up(B, tb)
    if b_pad != B:
        x = jnp.pad(x, ((0, b_pad - B), (0, 0)))

    vmem_need = 2 * weight_bytes + tb * per_row + headroom
    vmem_limit = int(min(max(vmem_need, 4 << 20), budget))

    inputs = (x,) + weights
    grid = (b_pad // tb,)
    out_shape = jax.ShapeDtypeStruct((b_pad, out_w), out_dtype)
    out_spec = pl.BlockSpec((tb, out_w), lambda i: (i, 0))

    def run(single_buffer_weights):
        if single_buffer_weights:
            def resident(a):
                # Constant block index -> single-buffer the resident weights.
                return pl.BlockSpec(a.shape, lambda i: (0, 0),
                                    pipeline_mode=pl.Buffered(1))
        else:
            def resident(a):
                return pl.BlockSpec(a.shape, lambda i: (0, 0))
        in_specs = [pl.BlockSpec((tb, D), lambda i: (i, 0))]
        in_specs += [resident(a) for a in weights]
        return pl.pallas_call(
            kernel,
            grid=grid,
            in_specs=in_specs,
            out_specs=out_spec,
            out_shape=out_shape,
            compiler_params=pltpu.CompilerParams(
                dimension_semantics=("parallel",),
                vmem_limit_bytes=vmem_limit,
            ),
        )(*inputs)

    if hasattr(pl, "Buffered"):
        try:
            slab = run(True)
        except Exception:
            slab = run(False)   # fall back if Buffered(1) is unsupported
    else:
        slab = run(False)

    out = slab[:B, :O].astype(jnp.float32)
    if not return_feature:
        return out
    feature = slab[:B, O:O + D].astype(jnp.float32)
    return out, feature


# --------------------------------------------------------------------------
# Parameter init (shapes follow the PyTorch module; fc2/BN2 unused by forward)
# --------------------------------------------------------------------------
def init_params(key, input_size, output_size):
    D = input_size
    D2 = D // 2
    D4 = D // 4
    ks = jax.random.split(key, 4)

    def lin(k, fan_in, fan_out):
        bound = 1.0 / jnp.sqrt(float(fan_in))
        kw, kb = jax.random.split(k)
        # stored as (in, out): already-transposed PyTorch Linear weight
        w = jax.random.uniform(kw, (fan_in, fan_out), jnp.float32, -bound, bound)
        b = jax.random.uniform(kb, (1, fan_out), jnp.float32, -bound, bound)
        return w, b

    w1, b1 = lin(ks[0], D, D)
    w3, b3 = lin(ks[1], D, D2)
    w4, b4 = lin(ks[2], D2, D4)
    w5, b5 = lin(ks[3], D4, output_size)

    def bn(dim):  # fresh-module BatchNorm1d state (eval mode)
        return dict(gamma=jnp.ones((1, dim), jnp.float32),
                    beta=jnp.zeros((1, dim), jnp.float32),
                    running_mean=jnp.zeros((1, dim), jnp.float32),
                    running_var=jnp.ones((1, dim), jnp.float32))

    return dict(w1=w1, b1=b1, w3=w3, b3=b3, w4=w4, b4=b4, w5=w5, b5=b5,
                bn1=bn(D), bn3=bn(D2))


# --------------------------------------------------------------------------
# References
# --------------------------------------------------------------------------
def reference_forward_prepared(x, prep, out_dtype=jnp.bfloat16):
    """Mirrors the kernel math exactly (same folded/padded bf16 operands)."""
    D, D2, D4, O, w_slab, w_out = prep["dims"]
    bf = jnp.bfloat16
    h1 = jnp.dot(x.astype(bf), prep["w1"],
                 preferred_element_type=jnp.float32) + prep["b1"]
    h = h1 * prep["s1"] + prep["t1"]
    h = jnp.where(h > 0.0, h, 0.01 * h)
    h = jnp.dot(h.astype(bf), prep["w3"],
                preferred_element_type=jnp.float32) + prep["b3"]
    h = jnp.maximum(h, 0.0)
    h = jnp.dot(h.astype(bf), prep["w4"],
                preferred_element_type=jnp.float32) + prep["b4"]
    h = jnp.maximum(h, 0.0)
    out = jnp.dot(h.astype(bf), prep["w5"],
                  preferred_element_type=jnp.float32) + prep["b5"]
    slab = h1.astype(out_dtype) + out.astype(out_dtype)
    return (slab[:, :O].astype(jnp.float32),
            slab[:, O:O + D].astype(jnp.float32))


def reference_forward_f32(x, raw, eps=1e-5):
    """Straight f32 port of the PyTorch forward (eval mode)."""
    def bn(h, p):
        scale = p["gamma"] / jnp.sqrt(p["running_var"] + eps)
        return (h - p["running_mean"]) * scale + p["beta"]

    h1 = x @ raw["w1"] + raw["b1"]
    feature = h1
    h = bn(h1, raw["bn1"])
    h = jnp.where(h > 0.0, h, 0.01 * h)
    h = h @ raw["w3"] + raw["b3"]
    h = bn(h, raw["bn3"])
    h = jnp.maximum(h, 0.0)
    h = h @ raw["w4"] + raw["b4"]
    h = jnp.maximum(h, 0.0)
    h = h @ raw["w5"] + raw["b5"]
    return h, feature


if __name__ == "__main__":
    INPUT_SIZE = 32
    OUTPUT_SIZE = 8
    BATCH = 8

    key = jax.random.PRNGKey(0)
    k_x, k_p = jax.random.split(key)

    x = jax.random.normal(k_x, (BATCH, INPUT_SIZE), dtype=jnp.float32)
    raw = init_params(k_p, INPUT_SIZE, OUTPUT_SIZE)
    prep = prepare_params(raw)

    out, feature = cmu_audio_forward(x, prep)
    out = jax.block_until_ready(out)
    feature = jax.block_until_ready(feature)
    assert out.shape == (BATCH, OUTPUT_SIZE)
    assert feature.shape == (BATCH, INPUT_SIZE)

    # Feature-free fast path.
    out_only = jax.block_until_ready(
        cmu_audio_forward(x, prep, return_feature=False))
    assert out_only.shape == (BATCH, OUTPUT_SIZE)

    # Tight check: same math (folded / padded / bf16 operands) in plain JAX.
    ref_out, ref_feat = reference_forward_prepared(x, prep)
    assert jnp.allclose(out, ref_out, atol=1e-2, rtol=1e-2)
    assert jnp.allclose(feature, ref_feat, atol=1e-2, rtol=1e-2)
    assert jnp.allclose(out_only, ref_out, atol=1e-2, rtol=1e-2)

    # Loose check against the pure-f32 PyTorch-equivalent forward
    # (difference is bf16 matmul-operand + bf16 output-slab rounding).
    f32_out, f32_feat = reference_forward_f32(x, raw)
    assert jnp.allclose(out, f32_out, atol=6e-2, rtol=6e-2)
    assert jnp.allclose(feature, f32_feat, atol=6e-2, rtol=6e-2)

    print("KERNEL_OK")
</pallas_src>

<mosaic_0001>
module attributes {stable_mosaic.version = 11 : i64} {
  func.func @_mlp_kernel_feat(%arg0: i32, %arg1: memref<8x32xbf16, #tpu.memory_space<vmem>>, %arg2: memref<32x128xbf16, #tpu.memory_space<vmem>>, %arg3: memref<1x128xf32, #tpu.memory_space<vmem>>, %arg4: memref<1x128xf32, #tpu.memory_space<vmem>>, %arg5: memref<1x128xf32, #tpu.memory_space<vmem>>, %arg6: memref<128x128xbf16, #tpu.memory_space<vmem>>, %arg7: memref<1x128xf32, #tpu.memory_space<vmem>>, %arg8: memref<128x128xbf16, #tpu.memory_space<vmem>>, %arg9: memref<1x128xf32, #tpu.memory_space<vmem>>, %arg10: memref<128x128xbf16, #tpu.memory_space<vmem>>, %arg11: memref<1x128xf32, #tpu.memory_space<vmem>>, %arg12: memref<8x128xbf16, #tpu.memory_space<vmem>>) attributes {dimension_semantics = [#tpu.dimension_semantics<parallel>], iteration_bounds = array<i64: 1>, scalar_prefetch = 0 : i64, scratch_operands = 0 : i64, tpu.core_type = #tpu.core_type<tc>, window_params = [{transform_indices = @transform_0, window_bounds = array<i64: 8, 32>}, {pipeline_mode = #tpu.pipeline_mode<synchronous>, transform_indices = @transform_1, window_bounds = array<i64: 32, 128>}, {pipeline_mode = #tpu.pipeline_mode<synchronous>, transform_indices = @transform_2, window_bounds = array<i64: 1, 128>}, {pipeline_mode = #tpu.pipeline_mode<synchronous>, transform_indices = @transform_3, window_bounds = array<i64: 1, 128>}, {pipeline_mode = #tpu.pipeline_mode<synchronous>, transform_indices = @transform_4, window_bounds = array<i64: 1, 128>}, {pipeline_mode = #tpu.pipeline_mode<synchronous>, transform_indices = @transform_5, window_bounds = array<i64: 128, 128>}, {pipeline_mode = #tpu.pipeline_mode<synchronous>, transform_indices = @transform_6, window_bounds = array<i64: 1, 128>}, {pipeline_mode = #tpu.pipeline_mode<synchronous>, transform_indices = @transform_7, window_bounds = array<i64: 128, 128>}, {pipeline_mode = #tpu.pipeline_mode<synchronous>, transform_indices = @transform_8, window_bounds = array<i64: 1, 128>}, {pipeline_mode = #tpu.pipeline_mode<synchronous>, transform_indices = @transform_9, window_bounds = array<i64: 128, 128>}, {pipeline_mode = #tpu.pipeline_mode<synchronous>, transform_indices = @transform_10, window_bounds = array<i64: 1, 128>}, {transform_indices = @transform_11, window_bounds = array<i64: 8, 128>}]} {
    %c0 = arith.constant 0 : index
    %c0_0 = arith.constant 0 : index
    %0 = vector.load %arg1[%c0, %c0_0] : memref<8x32xbf16, #tpu.memory_space<vmem>>, vector<8x32xbf16>
    %c0_1 = arith.constant 0 : index
    %c0_2 = arith.constant 0 : index
    %1 = vector.load %arg2[%c0_1, %c0_2] : memref<32x128xbf16, #tpu.memory_space<vmem>>, vector<32x128xbf16>
    %cst = arith.constant dense<0.000000e+00> : vector<8x128xf32>
    %2 = tpu.matmul %0, %1, %cst {dimension_numbers = #tpu.dot_dimension_numbers<[1], [0], [0], [1], [0, 0, 1, 1], [], []>} : vector<8x32xbf16>, vector<32x128xbf16>, vector<8x128xf32> -> vector<8x128xf32>
    %c0_3 = arith.constant 0 : index
    %c0_4 = arith.constant 0 : index
    %3 = vector.load %arg3[%c0_3, %c0_4] : memref<1x128xf32, #tpu.memory_space<vmem>>, vector<1x128xf32>
    %4 = vector.broadcast %3 : vector<1x128xf32> to vector<8x128xf32>
    %5 = arith.addf %2, %4 : vector<8x128xf32>
    %c0_5 = arith.constant 0 : index
    %c0_6 = arith.constant 0 : index
    %6 = vector.load %arg4[%c0_5, %c0_6] : memref<1x128xf32, #tpu.memory_space<vmem>>, vector<1x128xf32>
    %7 = vector.broadcast %6 : vector<1x128xf32> to vector<8x128xf32>
    %8 = arith.mulf %5, %7 : vector<8x128xf32>
    %c0_7 = arith.constant 0 : index
    %c0_8 = arith.constant 0 : index
    %9 = vector.load %arg5[%c0_7, %c0_8] : memref<1x128xf32, #tpu.memory_space<vmem>>, vector<1x128xf32>
    %10 = vector.broadcast %9 : vector<1x128xf32> to vector<8x128xf32>
    %11 = arith.addf %8, %10 : vector<8x128xf32>
    %12 = arith.truncf %5 : vector<8x128xf32> to vector<8x128xbf16>
    %c0_9 = arith.constant 0 : index
    %c0_10 = arith.constant 0 : index
    %13 = vector.load %arg12[%c0_9, %c0_10] : memref<8x128xbf16, #tpu.memory_space<vmem>>, vector<8x128xbf16>
    tpu.vector_store %arg12[%c0_9, %c0_10], %12 {strides = array<i32>} : memref<8x128xbf16, #tpu.memory_space<vmem>>, vector<8x128xbf16>,
    %cst_11 = arith.constant 0.000000e+00 : f32
    %14 = vector.broadcast %cst_11 : f32 to vector<8x128xf32>
    %15 = arith.cmpf ogt, %11, %14 : vector<8x128xf32>
    %cst_12 = arith.constant 0.00999999977 : f32
    %16 = vector.broadcast %cst_12 : f32 to vector<8x128xf32>
    %17 = arith.mulf %16, %11 : vector<8x128xf32>
    %18 = arith.select %15, %11, %17 : vector<8x128xi1>, vector<8x128xf32>
    %19 = arith.truncf %18 : vector<8x128xf32> to vector<8x128xbf16>
    %c0_13 = arith.constant 0 : index
    %c0_14 = arith.constant 0 : index
    %20 = vector.load %arg6[%c0_13, %c0_14] : memref<128x128xbf16, #tpu.memory_space<vmem>>, vector<128x128xbf16>
    %cst_15 = arith.constant dense<0.000000e+00> : vector<8x128xf32>
    %21 = tpu.matmul %19, %20, %cst_15 {dimension_numbers = #tpu.dot_dimension_numbers<[1], [0], [0], [1], [0, 0, 1, 1], [], []>} : vector<8x128xbf16>, vector<128x128xbf16>, vector<8x128xf32> -> vector<8x128xf32>
    %c0_16 = arith.constant 0 : index
    %c0_17 = arith.constant 0 : index
    %22 = vector.load %arg7[%c0_16, %c0_17] : memref<1x128xf32, #tpu.memory_space<vmem>>, vector<1x128xf32>
    %23 = vector.broadcast %22 : vector<1x128xf32> to vector<8x128xf32>
    %24 = arith.addf %21, %23 : vector<8x128xf32>
    %cst_18 = arith.constant 0.000000e+00 : f32
    %25 = vector.broadcast %cst_18 : f32 to vector<8x128xf32>
    %26 = arith.maximumf %24, %25 : vector<8x128xf32>
    %27 = arith.truncf %26 : vector<8x128xf32> to vector<8x128xbf16>
    %c0_19 = arith.constant 0 : index
    %c0_20 = arith.constant 0 : index
    %28 = vector.load %arg8[%c0_19, %c0_20] : memref<128x128xbf16, #tpu.memory_space<vmem>>, vector<128x128xbf16>
    %cst_21 = arith.constant dense<0.000000e+00> : vector<8x128xf32>
    %29 = tpu.matmul %27, %28, %cst_21 {dimension_numbers = #tpu.dot_dimension_numbers<[1], [0], [0], [1], [0, 0, 1, 1], [], []>} : vector<8x128xbf16>, vector<128x128xbf16>, vector<8x128xf32> -> vector<8x128xf32>
    %c0_22 = arith.constant 0 : index
    %c0_23 = arith.constant 0 : index
    %30 = vector.load %arg9[%c0_22, %c0_23] : memref<1x128xf32, #tpu.memory_space<vmem>>, vector<1x128xf32>
    %31 = vector.broadcast %30 : vector<1x128xf32> to vector<8x128xf32>
    %32 = arith.addf %29, %31 : vector<8x128xf32>
    %cst_24 = arith.constant 0.000000e+00 : f32
    %33 = vector.broadcast %cst_24 : f32 to vector<8x128xf32>
    %34 = arith.maximumf %32, %33 : vector<8x128xf32>
    %35 = arith.truncf %34 : vector<8x128xf32> to vector<8x128xbf16>
    %c0_25 = arith.constant 0 : index
    %c0_26 = arith.constant 0 : index
    %36 = vector.load %arg10[%c0_25, %c0_26] : memref<128x128xbf16, #tpu.memory_space<vmem>>, vector<128x128xbf16>
    %cst_27 = arith.constant dense<0.000000e+00> : vector<8x128xf32>
    %37 = tpu.matmul %35, %36, %cst_27 {dimension_numbers = #tpu.dot_dimension_numbers<[1], [0], [0], [1], [0, 0, 1, 1], [], []>} : vector<8x128xbf16>, vector<128x128xbf16>, vector<8x128xf32> -> vector<8x128xf32>
    %c0_28 = arith.constant 0 : index
    %c0_29 = arith.constant 0 : index
    %38 = vector.load %arg11[%c0_28, %c0_29] : memref<1x128xf32, #tpu.memory_space<vmem>>, vector<1x128xf32>
    %39 = vector.broadcast %38 : vector<1x128xf32> to vector<8x128xf32>
    %40 = arith.addf %37, %39 : vector<8x128xf32>
    %c0_30 = arith.constant 0 : index
    %c0_31 = arith.constant 0 : index
    %41 = vector.load %arg12[%c0_30, %c0_31] : memref<8x128xbf16, #tpu.memory_space<vmem>>, vector<8x128xbf16>
    %42 = arith.truncf %40 : vector<8x128xf32> to vector<8x128xbf16>
    %43 = arith.addf %41, %42 : vector<8x128xbf16>
    %c0_32 = arith.constant 0 : index
    %c0_33 = arith.constant 0 : index
    %44 = vector.load %arg12[%c0_32, %c0_33] : memref<8x128xbf16, #tpu.memory_space<vmem>>, vector<8x128xbf16>
    tpu.vector_store %arg12[%c0_32, %c0_33], %43 {strides = array<i32>} : memref<8x128xbf16, #tpu.memory_space<vmem>>, vector<8x128xbf16>,
    return
  }
  func.func @transform_0(%arg0: i32) -> (i32, i32) {
    %c0_i32 = arith.constant 0 : i32
    %c0_i32_0 = arith.constant 0 : i32
    return %arg0, %c0_i32 : i32, i32
  }
  func.func @transform_1(%arg0: i32) -> (i32, i32) {
    %c0_i32 = arith.constant 0 : i32
    %c0_i32_0 = arith.constant 0 : i32
    %c0_i32_1 = arith.constant 0 : i32
    return %c0_i32, %c0_i32_0 : i32, i32
  }
  func.func @transform_2(%arg0: i32) -> (i32, i32) {
    %c0_i32 = arith.constant 0 : i32
    %c0_i32_0 = arith.constant 0 : i32
    %c0_i32_1 = arith.constant 0 : i32
    return %c0_i32, %c0_i32_0 : i32, i32
  }
  func.func @transform_3(%arg0: i32) -> (i32, i32) {
    %c0_i32 = arith.constant 0 : i32
    %c0_i32_0 = arith.constant 0 : i32
    %c0_i32_1 = arith.constant 0 : i32
    return %c0_i32, %c0_i32_0 : i32, i32
  }
  func.func @transform_4(%arg0: i32) -> (i32, i32) {
    %c0_i32 = arith.constant 0 : i32
    %c0_i32_0 = arith.constant 0 : i32
    %c0_i32_1 = arith.constant 0 : i32
    return %c0_i32, %c0_i32_0 : i32, i32
  }
  func.func @transform_5(%arg0: i32) -> (i32, i32) {
    %c0_i32 = arith.constant 0 : i32
    %c0_i32_0 = arith.constant 0 : i32
    %c0_i32_1 = arith.constant 0 : i32
    return %c0_i32, %c0_i32_0 : i32, i32
  }
  func.func @transform_6(%arg0: i32) -> (i32, i32) {
    %c0_i32 = arith.constant 0 : i32
    %c0_i32_0 = arith.constant 0 : i32
    %c0_i32_1 = arith.constant 0 : i32
    return %c0_i32, %c0_i32_0 : i32, i32
  }
  func.func @transform_7(%arg0: i32) -> (i32, i32) {
    %c0_i32 = arith.constant 0 : i32
    %c0_i32_0 = arith.constant 0 : i32
    %c0_i32_1 = arith.constant 0 : i32
    return %c0_i32, %c0_i32_0 : i32, i32
  }
  func.func @transform_8(%arg0: i32) -> (i32, i32) {
    %c0_i32 = arith.constant 0 : i32
    %c0_i32_0 = arith.constant 0 : i32
    %c0_i32_1 = arith.constant 0 : i32
    return %c0_i32, %c0_i32_0 : i32, i32
  }
  func.func @transform_9(%arg0: i32) -> (i32, i32) {
    %c0_i32 = arith.constant 0 : i32
    %c0_i32_0 = arith.constant 0 : i32
    %c0_i32_1 = arith.constant 0 : i32
    return %c0_i32, %c0_i32_0 : i32, i32
  }
  func.func @transform_10(%arg0: i32) -> (i32, i32) {
    %c0_i32 = arith.constant 0 : i32
    %c0_i32_0 = arith.constant 0 : i32
    %c0_i32_1 = arith.constant 0 : i32
    return %c0_i32, %c0_i32_0 : i32, i32
  }
  func.func @transform_11(%arg0: i32) -> (i32, i32) {
    %c0_i32 = arith.constant 0 : i32
    %c0_i32_0 = arith.constant 0 : i32
    return %arg0, %c0_i32 : i32, i32
  }
}

module attributes {stable_mosaic.version = 11 : i64} {
  func.func @_mlp_kernel_feat(%arg0: i32, %arg1: memref<8x32xbf16, #tpu.memory_space<vmem>>, %arg2: memref<32x128xbf16, #tpu.memory_space<vmem>>, %arg3: memref<1x128xf32, #tpu.memory_space<vmem>>, %arg4: memref<1x128xf32, #tpu.memory_space<vmem>>, %arg5: memref<1x128xf32, #tpu.memory_space<vmem>>, %arg6: memref<128x128xbf16, #tpu.memory_space<vmem>>, %arg7: memref<1x128xf32, #tpu.memory_space<vmem>>, %arg8: memref<128x128xbf16, #tpu.memory_space<vmem>>, %arg9: memref<1x128xf32, #tpu.memory_space<vmem>>, %arg10: memref<128x128xbf16, #tpu.memory_space<vmem>>, %arg11: memref<1x128xf32, #tpu.memory_space<vmem>>, %arg12: memref<8x128xbf16, #tpu.memory_space<vmem>>) attributes {dimension_semantics = [#tpu.dimension_semantics<parallel>], iteration_bounds = array<i64: 1>, scalar_prefetch = 0 : i64, scratch_operands = 0 : i64, tpu.core_type = #tpu.core_type<tc>, window_params = [{transform_indices = @transform_0, window_bounds = array<i64: 8, 32>}, {pipeline_mode = #tpu.pipeline_mode<synchronous>, transform_indices = @transform_1, window_bounds = array<i64: 32, 128>}, {pipeline_mode = #tpu.pipeline_mode<synchronous>, transform_indices = @transform_2, window_bounds = array<i64: 1, 128>}, {pipeline_mode = #tpu.pipeline_mode<synchronous>, transform_indices = @transform_3, window_bounds = array<i64: 1, 128>}, {pipeline_mode = #tpu.pipeline_mode<synchronous>, transform_indices = @transform_4, window_bounds = array<i64: 1, 128>}, {pipeline_mode = #tpu.pipeline_mode<synchronous>, transform_indices = @transform_5, window_bounds = array<i64: 128, 128>}, {pipeline_mode = #tpu.pipeline_mode<synchronous>, transform_indices = @transform_6, window_bounds = array<i64: 1, 128>}, {pipeline_mode = #tpu.pipeline_mode<synchronous>, transform_indices = @transform_7, window_bounds = array<i64: 128, 128>}, {pipeline_mode = #tpu.pipeline_mode<synchronous>, transform_indices = @transform_8, window_bounds = array<i64: 1, 128>}, {pipeline_mode = #tpu.pipeline_mode<synchronous>, transform_indices = @transform_9, window_bounds = array<i64: 128, 128>}, {pipeline_mode = #tpu.pipeline_mode<synchronous>, transform_indices = @transform_10, window_bounds = array<i64: 1, 128>}, {transform_indices = @transform_11, window_bounds = array<i64: 8, 128>}]} {
    %c0 = arith.constant 0 : index
    %c0_0 = arith.constant 0 : index
    %0 = vector.load %arg1[%c0, %c0_0] : memref<8x32xbf16, #tpu.memory_space<vmem>>, vector<8x32xbf16>
    %c0_1 = arith.constant 0 : index
    %c0_2 = arith.constant 0 : index
    %1 = vector.load %arg2[%c0_1, %c0_2] : memref<32x128xbf16, #tpu.memory_space<vmem>>, vector<32x128xbf16>
    %cst = arith.constant dense<0.000000e+00> : vector<8x128xf32>
    %2 = tpu.matmul %0, %1, %cst {dimension_numbers = #tpu.dot_dimension_numbers<[1], [0], [0], [1], [0, 0, 1, 1], [], []>} : vector<8x32xbf16>, vector<32x128xbf16>, vector<8x128xf32> -> vector<8x128xf32>
    %c0_3 = arith.constant 0 : index
    %c0_4 = arith.constant 0 : index
    %3 = vector.load %arg3[%c0_3, %c0_4] : memref<1x128xf32, #tpu.memory_space<vmem>>, vector<1x128xf32>
    %4 = vector.broadcast %3 : vector<1x128xf32> to vector<8x128xf32>
    %5 = arith.addf %2, %4 : vector<8x128xf32>
    %c0_5 = arith.constant 0 : index
    %c0_6 = arith.constant 0 : index
    %6 = vector.load %arg4[%c0_5, %c0_6] : memref<1x128xf32, #tpu.memory_space<vmem>>, vector<1x128xf32>
    %7 = vector.broadcast %6 : vector<1x128xf32> to vector<8x128xf32>
    %8 = arith.mulf %5, %7 : vector<8x128xf32>
    %c0_7 = arith.constant 0 : index
    %c0_8 = arith.constant 0 : index
    %9 = vector.load %arg5[%c0_7, %c0_8] : memref<1x128xf32, #tpu.memory_space<vmem>>, vector<1x128xf32>
    %10 = vector.broadcast %9 : vector<1x128xf32> to vector<8x128xf32>
    %11 = arith.addf %8, %10 : vector<8x128xf32>
    %12 = arith.truncf %5 : vector<8x128xf32> to vector<8x128xbf16>
    %c0_9 = arith.constant 0 : index
    %c0_10 = arith.constant 0 : index
    %13 = vector.load %arg12[%c0_9, %c0_10] : memref<8x128xbf16, #tpu.memory_space<vmem>>, vector<8x128xbf16>
    tpu.vector_store %arg12[%c0_9, %c0_10], %12 {strides = array<i32>} : memref<8x128xbf16, #tpu.memory_space<vmem>>, vector<8x128xbf16>,
    %cst_11 = arith.constant 0.000000e+00 : f32
    %14 = vector.broadcast %cst_11 : f32 to vector<8x128xf32>
    %15 = arith.cmpf ogt, %11, %14 : vector<8x128xf32>
    %cst_12 = arith.constant 0.00999999977 : f32
    %16 = vector.broadcast %cst_12 : f32 to vector<8x128xf32>
    %17 = arith.mulf %16, %11 : vector<8x128xf32>
    %18 = arith.select %15, %11, %17 : vector<8x128xi1>, vector<8x128xf32>
    %19 = arith.truncf %18 : vector<8x128xf32> to vector<8x128xbf16>
    %c0_13 = arith.constant 0 : index
    %c0_14 = arith.constant 0 : index
    %20 = vector.load %arg6[%c0_13, %c0_14] : memref<128x128xbf16, #tpu.memory_space<vmem>>, vector<128x128xbf16>
    %cst_15 = arith.constant dense<0.000000e+00> : vector<8x128xf32>
    %21 = tpu.matmul %19, %20, %cst_15 {dimension_numbers = #tpu.dot_dimension_numbers<[1], [0], [0], [1], [0, 0, 1, 1], [], []>} : vector<8x128xbf16>, vector<128x128xbf16>, vector<8x128xf32> -> vector<8x128xf32>
    %c0_16 = arith.constant 0 : index
    %c0_17 = arith.constant 0 : index
    %22 = vector.load %arg7[%c0_16, %c0_17] : memref<1x128xf32, #tpu.memory_space<vmem>>, vector<1x128xf32>
    %23 = vector.broadcast %22 : vector<1x128xf32> to vector<8x128xf32>
    %24 = arith.addf %21, %23 : vector<8x128xf32>
    %cst_18 = arith.constant 0.000000e+00 : f32
    %25 = vector.broadcast %cst_18 : f32 to vector<8x128xf32>
    %26 = arith.maximumf %24, %25 : vector<8x128xf32>
    %27 = arith.truncf %26 : vector<8x128xf32> to vector<8x128xbf16>
    %c0_19 = arith.constant 0 : index
    %c0_20 = arith.constant 0 : index
    %28 = vector.load %arg8[%c0_19, %c0_20] : memref<128x128xbf16, #tpu.memory_space<vmem>>, vector<128x128xbf16>
    %cst_21 = arith.constant dense<0.000000e+00> : vector<8x128xf32>
    %29 = tpu.matmul %27, %28, %cst_21 {dimension_numbers = #tpu.dot_dimension_numbers<[1], [0], [0], [1], [0, 0, 1, 1], [], []>} : vector<8x128xbf16>, vector<128x128xbf16>, vector<8x128xf32> -> vector<8x128xf32>
    %c0_22 = arith.constant 0 : index
    %c0_23 = arith.constant 0 : index
    %30 = vector.load %arg9[%c0_22, %c0_23] : memref<1x128xf32, #tpu.memory_space<vmem>>, vector<1x128xf32>
    %31 = vector.broadcast %30 : vector<1x128xf32> to vector<8x128xf32>
    %32 = arith.addf %29, %31 : vector<8x128xf32>
    %cst_24 = arith.constant 0.000000e+00 : f32
    %33 = vector.broadcast %cst_24 : f32 to vector<8x128xf32>
    %34 = arith.maximumf %32, %33 : vector<8x128xf32>
    %35 = arith.truncf %34 : vector<8x128xf32> to vector<8x128xbf16>
    %c0_25 = arith.constant 0 : index
    %c0_26 = arith.constant 0 : index
    %36 = vector.load %arg10[%c0_25, %c0_26] : memref<128x128xbf16, #tpu.memory_space<vmem>>, vector<128x128xbf16>
    %cst_27 = arith.constant dense<0.000000e+00> : vector<8x128xf32>
    %37 = tpu.matmul %35, %36, %cst_27 {dimension_numbers = #tpu.dot_dimension_numbers<[1], [0], [0], [1], [0, 0, 1, 1], [], []>} : vector<8x128xbf16>, vector<128x128xbf16>, vector<8x128xf32> -> vector<8x128xf32>
    %c0_28 = arith.constant 0 : index
    %c0_29 = arith.constant 0 : index
    %38 = vector.load %arg11[%c0_28, %c0_29] : memref<1x128xf32, #tpu.memory_space<vmem>>, vector<1x128xf32>
    %39 = vector.broadcast %38 : vector<1x128xf32> to vector<8x128xf32>
    %40 = arith.addf %37, %39 : vector<8x128xf32>
    %c0_30 = arith.constant 0 : index
    %c0_31 = arith.constant 0 : index
    %41 = vector.load %arg12[%c0_30, %c0_31] : memref<8x128xbf16, #tpu.memory_space<vmem>>, vector<8x128xbf16>
    %42 = arith.truncf %40 : vector<8x128xf32> to vector<8x128xbf16>
    %43 = arith.addf %41, %42 : vector<8x128xbf16>
    %c0_32 = arith.constant 0 : index
    %c0_33 = arith.constant 0 : index
    %44 = vector.load %arg12[%c0_32, %c0_33] : memref<8x128xbf16, #tpu.memory_space<vmem>>, vector<8x128xbf16>
    tpu.vector_store %arg12[%c0_32, %c0_33], %43 {strides = array<i32>} : memref<8x128xbf16, #tpu.memory_space<vmem>>, vector<8x128xbf16>,
    return
  }
  func.func @transform_0(%arg0: i32) -> (i32, i32) {
    %c0_i32 = arith.constant 0 : i32
    %c0_i32_0 = arith.constant 0 : i32
    return %arg0, %c0_i32 : i32, i32
  }
  func.func @transform_1(%arg0: i32) -> (i32, i32) {
    %c0_i32 = arith.constant 0 : i32
    %c0_i32_0 = arith.constant 0 : i32
    %c0_i32_1 = arith.constant 0 : i32
    return %c0_i32, %c0_i32_0 : i32, i32
  }
  func.func @transform_2(%arg0: i32) -> (i32, i32) {
    %c0_i32 = arith.constant 0 : i32
    %c0_i32_0 = arith.constant 0 : i32
    %c0_i32_1 = arith.constant 0 : i32
    return %c0_i32, %c0_i32_0 : i32, i32
  }
  func.func @transform_3(%arg0: i32) -> (i32, i32) {
    %c0_i32 = arith.constant 0 : i32
    %c0_i32_0 = arith.constant 0 : i32
    %c0_i32_1 = arith.constant 0 : i32
    return %c0_i32, %c0_i32_0 : i32, i32
  }
  func.func @transform_4(%arg0: i32) -> (i32, i32) {
    %c0_i32 = arith.constant 0 : i32
    %c0_i32_0 = arith.constant 0 : i32
    %c0_i32_1 = arith.constant 0 : i32
    return %c0_i32, %c0_i32_0 : i32, i32
  }
  func.func @transform_5(%arg0: i32) -> (i32, i32) {
    %c0_i32 = arith.constant 0 : i32
    %c0_i32_0 = arith.constant 0 : i32
    %c0_i32_1 = arith.constant 0 : i32
    return %c0_i32, %c0_i32_0 : i32, i32
  }
  func.func @transform_6(%arg0: i32) -> (i32, i32) {
    %c0_i32 = arith.constant 0 : i32
    %c0_i32_0 = arith.constant 0 : i32
    %c0_i32_1 = arith.constant 0 : i32
    return %c0_i32, %c0_i32_0 : i32, i32
  }
  func.func @transform_7(%arg0: i32) -> (i32, i32) {
    %c0_i32 = arith.constant 0 : i32
    %c0_i32_0 = arith.constant 0 : i32
    %c0_i32_1 = arith.constant 0 : i32
    return %c0_i32, %c0_i32_0 : i32, i32
  }
  func.func @transform_8(%arg0: i32) -> (i32, i32) {
    %c0_i32 = arith.constant 0 : i32
    %c0_i32_0 = arith.constant 0 : i32
    %c0_i32_1 = arith.constant 0 : i32
    return %c0_i32, %c0_i32_0 : i32, i32
  }
  func.func @transform_9(%arg0: i32) -> (i32, i32) {
    %c0_i32 = arith.constant 0 : i32
    %c0_i32_0 = arith.constant 0 : i32
    %c0_i32_1 = arith.constant 0 : i32
    return %c0_i32, %c0_i32_0 : i32, i32
  }
  func.func @transform_10(%arg0: i32) -> (i32, i32) {
    %c0_i32 = arith.constant 0 : i32
    %c0_i32_0 = arith.constant 0 : i32
    %c0_i32_1 = arith.constant 0 : i32
    return %c0_i32, %c0_i32_0 : i32, i32
  }
  func.func @transform_11(%arg0: i32) -> (i32, i32) {
    %c0_i32 = arith.constant 0 : i32
    %c0_i32_0 = arith.constant 0 : i32
    return %arg0, %c0_i32 : i32, i32
  }
}

</mosaic_0001>

<bundles_post_ra>
// kernel: tpu_custom_call.1
= control target key start
LH: loop header
LB: loop body
LE: loop exit
PB: predicated region body
PF: predicated region fallthrough
CT: control target
= control target key end

     0   :  { %16 = vsyncpa [#allocation3], 0  ;;  %s1001_s0 = inlined_call_operand.hbm [shape: bf16[8,32], index: 0, kind: input, shape index: {}]   ;;  %s1002_s1 = inlined_call_operand.hbm [shape: bf16[32,128], index: 1, kind: input, shape index: {}]   ;;  %s1003_s2 = inlined_call_operand.vmem [shape: f32[1,128], index: 2, kind: input, shape index: {}]   ;;  %s1004_s3 = inlined_call_operand.vmem [shape: f32[1,128], index: 3, kind: input, shape index: {}]   ;;  %s1005_s4 = inlined_call_operand.vmem [shape: f32[1,128], index: 4, kind: input, shape index: {}]   ;;  %s1006_s5 = inlined_call_operand.hbm [shape: bf16[128,128], index: 5, kind: input, shape index: {}]   ;;  %s1007_s6 = inlined_call_operand.vmem [shape: f32[1,128], index: 6, kind: input, shape index: {}]   ;;  %s1008_s7 = inlined_call_operand.hbm [shape: bf16[128,128], index: 7, kind: input, shape index: {}]   ;;  %s1009_s8 = inlined_call_operand.vmem [shape: f32[1,128], index: 8, kind: input, shape index: {}]   ;;  %s1010_s9 = inlined_call_operand.hbm [shape: bf16[128,128], index: 9, kind: input, shape index: {}]   ;;  %s1011_s10 = inlined_call_operand.vmem [shape: f32[1,128], index: 10, kind: input, shape index: {}]   ;;  %s1012_s11 = inlined_call_operand.hbm [shape: bf16[8,128], index: 11, kind: output, shape index: {}]  }
   0x1   :  { %17 = vsyncpa [#allocation6], 0 }
   0x2   :  { %18 = vsyncpa [#allocation9], 0 }
   0x3   :  { %19 = vsyncpa [#allocation4], 0  ;;  %s849_s17 = smov [#allocation5]  }
   0x4   :  { %s35_s18 = sshll.u32 %s849_s17, 4  ;;  %s36_s18 = int_to_ptr.vmem [resolvable:$true] %s35_s18 }
   0x5   :  { %s729_s19 = scalar_lea.vmem %s36_s18, 256  ;;  %p734_p1 = scmp.lt.s32.totalorder %s36_s18, %s36_s18 }
   0x6   :  { %p730_p0 = scmp.ne.s32.totalorder %s36_s18, %s729_s19  ;;  %p735_p2 = scmp.lt.s32.totalorder %s729_s19, %s729_s19 }
   0x8   :  { %p736_p3 = por %p735_p2, %p734_p1 }
   0xa   :  { %p737_p4 = pnand %p736_p3, %p730_p0 }
   0xc   :  { %740 = shalt.err (!%p737_p4)
}
   0xd   :  { %s850_s20 = smov 64   ;;  %s851_s21 = smov 4  }
   0xe   :  { %41 = dma.hbm_to_vmem [thread:$0]  %s1002_s1, 256, %s36_s18, [#allocation6], %s850_s20, %s850_s20, %s851_s21  }
   0xf   :  { %s852_s24 = smov [#allocation8]   ;;  %s853_s26 = smov [#allocation2]  }
  0x10   :  { %s67_s25 = sshll.u32 %s852_s24, 4  ;;  %s26_s27 = sshll.u32 %s853_s26, 4  ;;  %s68_s25 = int_to_ptr.vmem [resolvable:$true] %s67_s25  ;;  %s27_s27 = int_to_ptr.vmem [resolvable:$true] %s26_s27 }
  0x11   :  { %s749_s28 = scalar_lea.vmem %s68_s25, 1024  ;;  %p754_p6 = scmp.lt.s32.totalorder %s68_s25, %s68_s25 }
  0x12   :  { %p750_p5 = scmp.ne.s32.totalorder %s68_s25, %s749_s28  ;;  %p755_p7 = scmp.lt.s32.totalorder %s749_s28, %s749_s28 }
  0x14   :  { %p756_p8 = por %p755_p7, %p754_p6 }
  0x16   :  { %p757_p9 = pnand %p756_p8, %p750_p5 }
  0x18   :  { %760 = shalt.err (!%p757_p9)
}
  0x19   :  { %73 = dma.hbm_to_vmem [thread:$0]  %s1008_s7, 1024, %s68_s25, [#allocation9], %s850_s20, %s850_s20, %s851_s21  }
  0x1a   :  { %s769_s1 = scalar_lea.vmem %s27_s27, 64  ;;  %p774_p11 = scmp.lt.s32.totalorder %s27_s27, %s27_s27 }
  0x1b   :  { %p770_p10 = scmp.ne.s32.totalorder %s27_s27, %s769_s1  ;;  %p775_p12 = scmp.lt.s32.totalorder %s769_s1, %s769_s1 }
  0x1d   :  { %p776_p13 = por %p775_p12, %p774_p11 }
  0x1f   :  { %p777_p0 = pnand %p776_p13, %p770_p10 }
  0x21   :  { %780 = shalt.err (!%p777_p0)
}
  0x22   :  { %29 = dma.hbm_to_vmem [thread:$0]  %s1001_s0, 64, %s27_s27, [#allocation3]  }
  0x23   :  { %s854_s14 = smov [#allocation7]   ;;  %s855_s16 = smov [#allocation10]  }
  0x24   :  { %s53_s15 = sshll.u32 %s854_s14, 4  ;;  %s81_s17 = sshll.u32 %s855_s16, 4  ;;  %s54_s15 = int_to_ptr.vmem [resolvable:$true] %s53_s15  ;;  %s82_s17 = int_to_ptr.vmem [resolvable:$true] %s81_s17 }
  0x25   :  { %s789_s18 = scalar_lea.vmem %s54_s15, 1024  ;;  %p794_p2 = scmp.lt.s32.totalorder %s54_s15, %s54_s15 }
  0x26   :  { %p790_p1 = scmp.ne.s32.totalorder %s54_s15, %s789_s18  ;;  %p795_p3 = scmp.lt.s32.totalorder %s789_s18, %s789_s18 }
  0x28   :  { %p796_p4 = por %p795_p3, %p794_p2 }
  0x2a   :  { %p797_p5 = pnand %p796_p4, %p790_p1 }
  0x2c   :  { %800 = shalt.err (!%p797_p5)
}
  0x2d   :  { %59 = dma.hbm_to_vmem [thread:$0]  %s1006_s5, 1024, %s54_s15, [#allocation6], %s850_s20, %s850_s20, %s851_s21  }
  0x2e   :  { %s809_s0 = scalar_lea.vmem %s82_s17, 1024  ;;  %p814_p7 = scmp.lt.s32.totalorder %s82_s17, %s82_s17 }
  0x2f   :  { %p810_p6 = scmp.ne.s32.totalorder %s82_s17, %s809_s0  ;;  %p815_p8 = scmp.lt.s32.totalorder %s809_s0, %s809_s0 }
  0x31   :  { %p816_p9 = por %p815_p8, %p814_p7 }
  0x33   :  { %p817_p10 = pnand %p816_p9, %p810_p6 }
  0x35   :  { %820 = shalt.err (!%p817_p10)
}
  0x36   :  { %87 = dma.hbm_to_vmem [thread:$0]  %s1010_s9, 1024, %s82_s17, [#allocation9], %s850_s20, %s850_s20, %s851_s21  }
  0x37   :  { %841 = dma.done.wait [#allocation3], 64  }
  0x38   :  { %842 = vsyncadd [#allocation3], 4294967232 }
  0x39   :  { %843 = dma.done.wait [#allocation6], 1280  }
  0x3a   :  { %844 = vsyncadd [#allocation6], 4294966016 }
  0x3b   :  { %845 = dma.done.wait [#allocation9], 2048  }
  0x3c   :  { %846 = vsyncadd [#allocation9], 4294965248  ;;  %v856_v0 = vmov 0.0   ;;  %vm857_vm0 = vmmov 0   ;;  %v695_v1 = vld [vmem:[#allocation5 + $0x8] sm:$0xff]   ;;  %v696_v2 = vld [vmem:[#allocation5] sm:$0xff]  }
  0x3d   :  { %617 = vmatprep.subr.bf16.mxu0 %v856_v0  ;;  %621 = vmatprep.mubr.msk.bf16.mxu0 %vm857_vm0, %v856_v0  ;;  %v697_v3 = vld [vmem:[#allocation7 + $0x38] sm:$0xff]   ;;  %vm130_vm1 = vcmask 261120   ;;  %v698_v4 = vld [vmem:[#allocation7 + $0x30] sm:$0xff]   ;;  %v106_v5 = vld [vmem:[#allocation2] sm:$0xf]  ;;  %s858_s28 = smov [#allocation11]  }
  0x3e   :  { %625 = vmatprep.subr.bf16.mxu1 %v856_v0  ;;  %641 = vmatprep.mubr.msk.bf16.mxu1 %vm857_vm0, %v856_v0  ;;  %v699_v6 = vld [vmem:[#allocation7 + $0x28] sm:$0xff]   ;;  %v700_v7 = vld [vmem:[#allocation7 + $0x20] sm:$0xff]   ;;  %v701_v8 = vld [vmem:[#allocation7 + $0x18] sm:$0xff]   ;;  %s543_s29 = sshll.u32 %s858_s28, 4  ;;  %s544_s29 = int_to_ptr.vmem [resolvable:$true] %s543_s29 }
  0x3f   :  { %618 = vmatpush3.bf16.msra.mxu0 %v695_v1  ;;  %626 = vmatpush3.bf16.msra.mxu1 %v697_v3  ;;  %v702_v9 = vld [vmem:[#allocation7 + $0x10] sm:$0xff]   ;;  %v703_v10 = vld [vmem:[#allocation7 + $0x8] sm:$0xff]   ;;  %v704_v11 = vld [vmem:[#allocation7] sm:$0xff]   ;;  %p826_p12 = scmp.lt.s32.totalorder %s544_s29, %s544_s29 }
  0x40   :  { %619 = vmatprep.subr.bf16.mxu0 %v856_v0  ;;  %627 = vmatprep.subr.bf16.mxu1 %v856_v0  ;;  %v705_v12 = vld [vmem:[#allocation8 + $0x38] sm:$0xff]   ;;  %v706_v13 = vld [vmem:[#allocation8 + $0x30] sm:$0xff]   ;;  %v707_v14 = vld [vmem:[#allocation8 + $0x28] sm:$0xff]  }
  0x41   :  { %v708_v15 = vld [vmem:[#allocation8 + $0x20] sm:$0xff]   ;;  %v709_v16 = vld [vmem:[#allocation8 + $0x18] sm:$0xff]   ;;  %v710_v17 = vld [vmem:[#allocation8 + $0x10] sm:$0xff]  }
  0x42   :  { %v554_v18 = vld [vmem:[%s1003_s2] ss:$0 sm:$0xff]  ;;  %v712_v33 = vld [vmem:[#allocation8] sm:$0xff]   ;;  %v713_v34 = vld [vmem:[#allocation10 + $0x38] sm:$0xff]  }
  0x43   :  { %620 = vmatpush3.bf16.msra.mxu0 %v696_v2  ;;  %628 = vmatpush3.bf16.msra.mxu1 %v698_v4  ;;  %v558_v20 = vld [vmem:[%s1004_s3] ss:$0 sm:$0xff]  ;;  %v714_v35 = vld [vmem:[#allocation10 + $0x30] sm:$0xff]   ;;  %v716_v37 = vld [vmem:[#allocation10 + $0x20] sm:$0xff]  }
  0x44   :  { %645 = vmatprep.subr.bf16.mxu0 %v856_v0  ;;  %629 = vmatprep.subr.bf16.mxu1 %v856_v0  ;;  %v559_v22 = vld [vmem:[%s1005_s4] ss:$0 sm:$0xff]  ;;  %v717_v38 = vld [vmem:[#allocation10 + $0x18] sm:$0xff]   ;;  %v718_v39 = vld [vmem:[#allocation10 + $0x10] sm:$0xff]  }
  0x45   :  { %v711_v32 = vld [vmem:[#allocation8 + $0x8] sm:$0xff]   ;;  %v720_v49 = vld [vmem:[#allocation10] sm:$0xff]  }
  0x46   :  { %622 = vmatmul.mubr.msk.bf16.vlgmr.msra.gmra.mxu0 %vm130_vm1, %v106_v5  ;;  %v715_v36 = vld [vmem:[#allocation10 + $0x28] sm:$0xff]  }
  0x47   :  { %661 = vmatprep.mubr.msk.bf16.mxu0 %vm857_vm0, %v856_v0  ;;  %630 = vmatpush3.bf16.msra.mxu1 %v699_v6  ;;  %v560_v40 = vld [vmem:[%s1007_s6] ss:$0 sm:$0xff] }
  0x48   :  { %631 = vmatprep.subr.bf16.mxu1 %v856_v0  ;;  %646 = vmatpush3.bf16.msra.mxu0 %v705_v12  ;;  %v719_v48 = vld [vmem:[#allocation10 + $0x8] sm:$0xff]  }
  0x49   :  { %647 = vmatprep.subr.bf16.mxu0 %v856_v0  ;;  %v569_v50 = vld [vmem:[%s1009_s8] ss:$0 sm:$0xff]  ;;  %s821_s8 = scalar_lea.vmem %s544_s29, 64 }
  0x4a   :  { %v578_v58 = vld [vmem:[%s1011_s10] ss:$0 sm:$0xff]  ;;  %p822_p11 = scmp.ne.s32.totalorder %s544_s29, %s821_s8  ;;  %p827_p13 = scmp.lt.s32.totalorder %s821_s8, %s821_s8 }
  0x4b   :  { %632 = vmatpush3.bf16.msra.mxu1 %v700_v7 }
  0x4c   :  { %633 = vmatprep.subr.bf16.mxu1 %v856_v0  ;;  %648 = vmatpush3.bf16.msra.mxu0 %v706_v13  ;;  %p828_p0 = por %p827_p13, %p826_p12 }
  0x4d   :  { %649 = vmatprep.subr.bf16.mxu0 %v856_v0 }
  0x4e   :  { %p829_p1 = pnand %p828_p0, %p822_p11 }
  0x4f   :  { %634 = vmatpush3.bf16.msra.mxu1 %v701_v8 }
  0x50   :  { %635 = vmatprep.subr.bf16.mxu1 %v856_v0  ;;  %650 = vmatpush3.bf16.msra.mxu0 %v707_v14 }
  0x51   :  { %651 = vmatprep.subr.bf16.mxu0 %v856_v0 }
  0x53   :  { %636 = vmatpush3.bf16.msra.mxu1 %v702_v9 }
  0x54   :  { %637 = vmatprep.subr.bf16.mxu1 %v856_v0  ;;  %652 = vmatpush3.bf16.msra.mxu0 %v708_v15 }
  0x55   :  { %653 = vmatprep.subr.bf16.mxu0 %v856_v0 }
  0x57   :  { %638 = vmatpush3.bf16.msra.mxu1 %v703_v10 }
  0x58   :  { %639 = vmatprep.subr.bf16.mxu1 %v856_v0  ;;  %654 = vmatpush3.bf16.msra.mxu0 %v709_v16 }
  0x59   :  { %655 = vmatprep.subr.bf16.mxu0 %v856_v0 }
  0x5b   :  { %640 = vmatpush3.bf16.msra.mxu1 %v704_v11 }
  0x5c   :  { %665 = vmatprep.subr.bf16.mxu1 %v856_v0  ;;  %656 = vmatpush3.bf16.msra.mxu0 %v710_v17 }
  0x5d   :  { %657 = vmatprep.subr.bf16.mxu0 %v856_v0 }
  0x60   :  { %658 = vmatpush3.bf16.msra.mxu0 %v711_v32 }
  0x61   :  { %659 = vmatprep.subr.bf16.mxu0 %v856_v0 }
  0x64   :  { %660 = vmatpush3.bf16.msra.mxu0 %v712_v33 }
 0x106   :  { %v168_v19 = vpop.f32.mrf.mxu0 }
 0x107   :  { %v169_v21 = vadd.f32 %v554_v18, %v168_v19 }
 0x108   :  { %v623_v23 = vpop.f32.mrf.mxu0 }
 0x109   :  { %v181_v24 = vmul.f32 %v558_v20, %v169_v21  ;;  %v190_v25 = vpack.c.bf16 %v169_v21, %v169_v21 }
 0x10a   :  { %v171_v26 = vpop.f32.mrf.mxu0 }
 0x10b   :  { %v189_v27 = vadd.f32 %v559_v22, %v181_v24  ;;  %191 = vst [vmem:[#allocation11] sm:$0xf] %v190_v25 }
 0x10c   :  { %v624_v28 = vpop.f32.mrf.mxu0 }
 0x10d   :  { %vm192_vm2 = vcmp.gt.f32.partialorder %v189_v27, 0.0  ;;  %v193_v29 = vmul.f32 0.01, %v189_v27 }
 0x10f   :  { %v194_v30 = vsel %vm192_vm2, %v189_v27, %v193_v29 }
 0x110   :  { %v195_v31 = vpack.c.bf16 %v194_v30, %v194_v30 }
 0x112   :  { %642 = vmatmul.mubr.bf16.vlgmr.msra.gmra.mxu1 %v195_v31  ;;  %v533_v63 = vld [vmem:[#allocation11] sm:$0xf] }
 0x113   :  { %681 = vmatprep.mubr.msk.bf16.mxu1 %vm857_vm0, %v856_v0  ;;  %666 = vmatpush3.bf16.msra.mxu1 %v713_v34 }
 0x114   :  { %667 = vmatprep.subr.bf16.mxu1 %v856_v0 }
 0x117   :  { %668 = vmatpush3.bf16.msra.mxu1 %v714_v35 }
 0x118   :  { %669 = vmatprep.subr.bf16.mxu1 %v856_v0 }
 0x11b   :  { %670 = vmatpush3.bf16.msra.mxu1 %v715_v36 }
 0x11c   :  { %671 = vmatprep.subr.bf16.mxu1 %v856_v0 }
 0x11f   :  { %672 = vmatpush3.bf16.msra.mxu1 %v716_v37 }
 0x120   :  { %673 = vmatprep.subr.bf16.mxu1 %v856_v0 }
 0x123   :  { %674 = vmatpush3.bf16.msra.mxu1 %v717_v38 }
 0x124   :  { %675 = vmatprep.subr.bf16.mxu1 %v856_v0 }
 0x127   :  { %676 = vmatpush3.bf16.msra.mxu1 %v718_v39 }
 0x128   :  { %677 = vmatprep.subr.bf16.mxu1 %v856_v0 }
 0x12b   :  { %678 = vmatpush3.bf16.msra.mxu1 %v719_v48 }
 0x12c   :  { %679 = vmatprep.subr.bf16.mxu1 %v856_v0 }
 0x12f   :  { %680 = vmatpush3.bf16.msra.mxu1 %v720_v49 }
 0x1d2   :  { %v301_v41 = vpop.f32.mrf.mxu1 }
 0x1d3   :  { %v302_v42 = vadd.f32 %v560_v40, %v301_v41 }
 0x1d4   :  { %v643_v43 = vpop.f32.mrf.mxu1 }
 0x1d5   :  { %v307_v44 = vmax.f32 %v302_v42, 0.0 }
 0x1d6   :  { %v304_v45 = vpop.f32.mrf.mxu1 }
 0x1d7   :  { %v308_v46 = vpack.c.bf16 %v307_v44, %v307_v44 }
 0x1d8   :  { %v644_v47 = vpop.f32.mrf.mxu1 }
 0x1d9   :  { %662 = vmatmul.mubr.bf16.vlgmr.msra.gmra.mxu0 %v308_v46 }
 0x299   :  { %v414_v51 = vpop.f32.mrf.mxu0 }
 0x29a   :  { %v415_v52 = vadd.f32 %v569_v50, %v414_v51 }
 0x29b   :  { %v663_v53 = vpop.f32.mrf.mxu0 }
 0x29c   :  { %v420_v54 = vmax.f32 %v415_v52, 0.0 }
 0x29d   :  { %v417_v55 = vpop.f32.mrf.mxu0 }
 0x29e   :  { %v421_v56 = vpack.c.bf16 %v420_v54, %v420_v54 }
 0x29f   :  { %v664_v57 = vpop.f32.mrf.mxu0 }
 0x2a0   :  { %682 = vmatmul.mubr.bf16.vlgmr.msra.gmra.mxu1 %v421_v56 }
 0x360   :  { %v527_v59 = vpop.f32.mrf.mxu1 }
 0x361   :  { %v528_v60 = vadd.f32 %v578_v58, %v527_v59 }
 0x362   :  { %v683_v61 = vpop.f32.mrf.mxu1 }
 0x363   :  { %v534_v62 = vpack.c.bf16 %v528_v60, %v528_v60 }
 0x364   :  { %v530_v0 = vpop.f32.mrf.mxu1 }
 0x365   :  { %v535_v1 = vadd.bf16 %v534_v62, %v533_v63 }
 0x366   :  { %v684_v2 = vpop.f32.mrf.mxu1 }
 0x367   :  { %536 = vst [vmem:[#allocation11] sm:$0xf] %v535_v1 }
 0x368   :  { %832 = shalt.err (!%p829_p1)
}
 0x369   :  { %546 = dma.vmem_to_hbm [thread:$0]  %s544_s29, 64, %s1012_s11, [#allocation4]  }
 0x36a   :  { %847 = dma.done.wait [#allocation4], 64  }
 0x36b   :  { %848 = vsyncadd [#allocation4], 4294967232 }
 0x36c   :  { %550 = vsyncpa [#allocation3], 1 }
 0x36d   :  { %551 = vsyncpa [#allocation6], 1 }
 0x36e   :  { %552 = vsyncpa [#allocation9], 1 }
 0x36f   :  { %553 = vsyncpa [#allocation4], 1 }

// kernel: tpu_custom_call.1
= control target key start
LH: loop header
LB: loop body
LE: loop exit
PB: predicated region body
PF: predicated region fallthrough
CT: control target
= control target key end

     0   :  { %16 = vsyncpa [#allocation3], 0  ;;  %s1001_s0 = inlined_call_operand.hbm [shape: bf16[8,32], index: 0, kind: input, shape index: {}]   ;;  %s1002_s1 = inlined_call_operand.hbm [shape: bf16[32,128], index: 1, kind: input, shape index: {}]   ;;  %s1003_s2 = inlined_call_operand.vmem [shape: f32[1,128], index: 2, kind: input, shape index: {}]   ;;  %s1004_s3 = inlined_call_operand.vmem [shape: f32[1,128], index: 3, kind: input, shape index: {}]   ;;  %s1005_s4 = inlined_call_operand.vmem [shape: f32[1,128], index: 4, kind: input, shape index: {}]   ;;  %s1006_s5 = inlined_call_operand.hbm [shape: bf16[128,128], index: 5, kind: input, shape index: {}]   ;;  %s1007_s6 = inlined_call_operand.vmem [shape: f32[1,128], index: 6, kind: input, shape index: {}]   ;;  %s1008_s7 = inlined_call_operand.hbm [shape: bf16[128,128], index: 7, kind: input, shape index: {}]   ;;  %s1009_s8 = inlined_call_operand.vmem [shape: f32[1,128], index: 8, kind: input, shape index: {}]   ;;  %s1010_s9 = inlined_call_operand.hbm [shape: bf16[128,128], index: 9, kind: input, shape index: {}]   ;;  %s1011_s10 = inlined_call_operand.vmem [shape: f32[1,128], index: 10, kind: input, shape index: {}]   ;;  %s1012_s11 = inlined_call_operand.hbm [shape: bf16[8,128], index: 11, kind: output, shape index: {}]  }
   0x1   :  { %17 = vsyncpa [#allocation6], 0 }
   0x2   :  { %18 = vsyncpa [#allocation9], 0 }
   0x3   :  { %19 = vsyncpa [#allocation4], 0  ;;  %s849_s17 = smov [#allocation5]  }
   0x4   :  { %s35_s18 = sshll.u32 %s849_s17, 4  ;;  %s36_s18 = int_to_ptr.vmem [resolvable:$true] %s35_s18 }
   0x5   :  { %s729_s19 = scalar_lea.vmem %s36_s18, 256  ;;  %p734_p1 = scmp.lt.s32.totalorder %s36_s18, %s36_s18 }
   0x6   :  { %p730_p0 = scmp.ne.s32.totalorder %s36_s18, %s729_s19  ;;  %p735_p2 = scmp.lt.s32.totalorder %s729_s19, %s729_s19 }
   0x8   :  { %p736_p3 = por %p735_p2, %p734_p1 }
   0xa   :  { %p737_p4 = pnand %p736_p3, %p730_p0 }
   0xc   :  { %740 = shalt.err (!%p737_p4)
}
   0xd   :  { %s850_s20 = smov 64   ;;  %s851_s21 = smov 4  }
   0xe   :  { %41 = dma.hbm_to_vmem [thread:$0]  %s1002_s1, 256, %s36_s18, [#allocation6], %s850_s20, %s850_s20, %s851_s21  }
   0xf   :  { %s852_s24 = smov [#allocation8]   ;;  %s853_s26 = smov [#allocation2]  }
  0x10   :  { %s67_s25 = sshll.u32 %s852_s24, 4  ;;  %s26_s27 = sshll.u32 %s853_s26, 4  ;;  %s68_s25 = int_to_ptr.vmem [resolvable:$true] %s67_s25  ;;  %s27_s27 = int_to_ptr.vmem [resolvable:$true] %s26_s27 }
  0x11   :  { %s749_s28 = scalar_lea.vmem %s68_s25, 1024  ;;  %p754_p6 = scmp.lt.s32.totalorder %s68_s25, %s68_s25 }
  0x12   :  { %p750_p5 = scmp.ne.s32.totalorder %s68_s25, %s749_s28  ;;  %p755_p7 = scmp.lt.s32.totalorder %s749_s28, %s749_s28 }
  0x14   :  { %p756_p8 = por %p755_p7, %p754_p6 }
  0x16   :  { %p757_p9 = pnand %p756_p8, %p750_p5 }
  0x18   :  { %760 = shalt.err (!%p757_p9)
}
  0x19   :  { %73 = dma.hbm_to_vmem [thread:$0]  %s1008_s7, 1024, %s68_s25, [#allocation9], %s850_s20, %s850_s20, %s851_s21  }
  0x1a   :  { %s769_s1 = scalar_lea.vmem %s27_s27, 64  ;;  %p774_p11 = scmp.lt.s32.totalorder %s27_s27, %s27_s27 }
  0x1b   :  { %p770_p10 = scmp.ne.s32.totalorder %s27_s27, %s769_s1  ;;  %p775_p12 = scmp.lt.s32.totalorder %s769_s1, %s769_s1 }
  0x1d   :  { %p776_p13 = por %p775_p12, %p774_p11 }
  0x1f   :  { %p777_p0 = pnand %p776_p13, %p770_p10 }
  0x21   :  { %780 = shalt.err (!%p777_p0)
}
  0x22   :  { %29 = dma.hbm_to_vmem [thread:$0]  %s1001_s0, 64, %s27_s27, [#allocation3]  }
  0x23   :  { %s854_s14 = smov [#allocation7]   ;;  %s855_s16 = smov [#allocation10]  }
  0x24   :  { %s53_s15 = sshll.u32 %s854_s14, 4  ;;  %s81_s17 = sshll.u32 %s855_s16, 4  ;;  %s54_s15 = int_to_ptr.vmem [resolvable:$true] %s53_s15  ;;  %s82_s17 = int_to_ptr.vmem [resolvable:$true] %s81_s17 }
  0x25   :  { %s789_s18 = scalar_lea.vmem %s54_s15, 1024  ;;  %p794_p2 = scmp.lt.s32.totalorder %s54_s15, %s54_s15 }
  0x26   :  { %p790_p1 = scmp.ne.s32.totalorder %s54_s15, %s789_s18  ;;  %p795_p3 = scmp.lt.s32.totalorder %s789_s18, %s789_s18 }
  0x28   :  { %p796_p4 = por %p795_p3, %p794_p2 }
  0x2a   :  { %p797_p5 = pnand %p796_p4, %p790_p1 }
  0x2c   :  { %800 = shalt.err (!%p797_p5)
}
  0x2d   :  { %59 = dma.hbm_to_vmem [thread:$0]  %s1006_s5, 1024, %s54_s15, [#allocation6], %s850_s20, %s850_s20, %s851_s21  }
  0x2e   :  { %s809_s0 = scalar_lea.vmem %s82_s17, 1024  ;;  %p814_p7 = scmp.lt.s32.totalorder %s82_s17, %s82_s17 }
  0x2f   :  { %p810_p6 = scmp.ne.s32.totalorder %s82_s17, %s809_s0  ;;  %p815_p8 = scmp.lt.s32.totalorder %s809_s0, %s809_s0 }
  0x31   :  { %p816_p9 = por %p815_p8, %p814_p7 }
  0x33   :  { %p817_p10 = pnand %p816_p9, %p810_p6 }
  0x35   :  { %820 = shalt.err (!%p817_p10)
}
  0x36   :  { %87 = dma.hbm_to_vmem [thread:$0]  %s1010_s9, 1024, %s82_s17, [#allocation9], %s850_s20, %s850_s20, %s851_s21  }
  0x37   :  { %841 = dma.done.wait [#allocation3], 64  }
  0x38   :  { %842 = vsyncadd [#allocation3], 4294967232 }
  0x39   :  { %843 = dma.done.wait [#allocation6], 1280  }
  0x3a   :  { %844 = vsyncadd [#allocation6], 4294966016 }
  0x3b   :  { %845 = dma.done.wait [#allocation9], 2048  }
  0x3c   :  { %846 = vsyncadd [#allocation9], 4294965248  ;;  %v856_v0 = vmov 0.0   ;;  %vm857_vm0 = vmmov 0   ;;  %v695_v1 = vld [vmem:[#allocation5 + $0x8] sm:$0xff]   ;;  %v696_v2 = vld [vmem:[#allocation5] sm:$0xff]  }
  0x3d   :  { %617 = vmatprep.subr.bf16.mxu0 %v856_v0  ;;  %621 = vmatprep.mubr.msk.bf16.mxu0 %vm857_vm0, %v856_v0  ;;  %v697_v3 = vld [vmem:[#allocation7 + $0x38] sm:$0xff]   ;;  %vm130_vm1 = vcmask 261120   ;;  %v698_v4 = vld [vmem:[#allocation7 + $0x30] sm:$0xff]   ;;  %v106_v5 = vld [vmem:[#allocation2] sm:$0xf]  ;;  %s858_s28 = smov [#allocation11]  }
  0x3e   :  { %625 = vmatprep.subr.bf16.mxu1 %v856_v0  ;;  %641 = vmatprep.mubr.msk.bf16.mxu1 %vm857_vm0, %v856_v0  ;;  %v699_v6 = vld [vmem:[#allocation7 + $0x28] sm:$0xff]   ;;  %v700_v7 = vld [vmem:[#allocation7 + $0x20] sm:$0xff]   ;;  %v701_v8 = vld [vmem:[#allocation7 + $0x18] sm:$0xff]   ;;  %s543_s29 = sshll.u32 %s858_s28, 4  ;;  %s544_s29 = int_to_ptr.vmem [resolvable:$true] %s543_s29 }
  0x3f   :  { %618 = vmatpush3.bf16.msra.mxu0 %v695_v1  ;;  %626 = vmatpush3.bf16.msra.mxu1 %v697_v3  ;;  %v702_v9 = vld [vmem:[#allocation7 + $0x10] sm:$0xff]   ;;  %v703_v10 = vld [vmem:[#allocation7 + $0x8] sm:$0xff]   ;;  %v704_v11 = vld [vmem:[#allocation7] sm:$0xff]   ;;  %p826_p12 = scmp.lt.s32.totalorder %s544_s29, %s544_s29 }
  0x40   :  { %619 = vmatprep.subr.bf16.mxu0 %v856_v0  ;;  %627 = vmatprep.subr.bf16.mxu1 %v856_v0  ;;  %v705_v12 = vld [vmem:[#allocation8 + $0x38] sm:$0xff]   ;;  %v706_v13 = vld [vmem:[#allocation8 + $0x30] sm:$0xff]   ;;  %v707_v14 = vld [vmem:[#allocation8 + $0x28] sm:$0xff]  }
  0x41   :  { %v708_v15 = vld [vmem:[#allocation8 + $0x20] sm:$0xff]   ;;  %v709_v16 = vld [vmem:[#allocation8 + $0x18] sm:$0xff]   ;;  %v710_v17 = vld [vmem:[#allocation8 + $0x10] sm:$0xff]  }
  0x42   :  { %v554_v18 = vld [vmem:[%s1003_s2] ss:$0 sm:$0xff]  ;;  %v712_v33 = vld [vmem:[#allocation8] sm:$0xff]   ;;  %v713_v34 = vld [vmem:[#allocation10 + $0x38] sm:$0xff]  }
  0x43   :  { %620 = vmatpush3.bf16.msra.mxu0 %v696_v2  ;;  %628 = vmatpush3.bf16.msra.mxu1 %v698_v4  ;;  %v558_v20 = vld [vmem:[%s1004_s3] ss:$0 sm:$0xff]  ;;  %v714_v35 = vld [vmem:[#allocation10 + $0x30] sm:$0xff]   ;;  %v716_v37 = vld [vmem:[#allocation10 + $0x20] sm:$0xff]  }
  0x44   :  { %645 = vmatprep.subr.bf16.mxu0 %v856_v0  ;;  %629 = vmatprep.subr.bf16.mxu1 %v856_v0  ;;  %v559_v22 = vld [vmem:[%s1005_s4] ss:$0 sm:$0xff]  ;;  %v717_v38 = vld [vmem:[#allocation10 + $0x18] sm:$0xff]   ;;  %v718_v39 = vld [vmem:[#allocation10 + $0x10] sm:$0xff]  }
  0x45   :  { %v711_v32 = vld [vmem:[#allocation8 + $0x8] sm:$0xff]   ;;  %v720_v49 = vld [vmem:[#allocation10] sm:$0xff]  }
  0x46   :  { %622 = vmatmul.mubr.msk.bf16.vlgmr.msra.gmra.mxu0 %vm130_vm1, %v106_v5  ;;  %v715_v36 = vld [vmem:[#allocation10 + $0x28] sm:$0xff]  }
  0x47   :  { %661 = vmatprep.mubr.msk.bf16.mxu0 %vm857_vm0, %v856_v0  ;;  %630 = vmatpush3.bf16.msra.mxu1 %v699_v6  ;;  %v560_v40 = vld [vmem:[%s1007_s6] ss:$0 sm:$0xff] }
  0x48   :  { %631 = vmatprep.subr.bf16.mxu1 %v856_v0  ;;  %646 = vmatpush3.bf16.msra.mxu0 %v705_v12  ;;  %v719_v48 = vld [vmem:[#allocation10 + $0x8] sm:$0xff]  }
  0x49   :  { %647 = vmatprep.subr.bf16.mxu0 %v856_v0  ;;  %v569_v50 = vld [vmem:[%s1009_s8] ss:$0 sm:$0xff]  ;;  %s821_s8 = scalar_lea.vmem %s544_s29, 64 }
  0x4a   :  { %v578_v58 = vld [vmem:[%s1011_s10] ss:$0 sm:$0xff]  ;;  %p822_p11 = scmp.ne.s32.totalorder %s544_s29, %s821_s8  ;;  %p827_p13 = scmp.lt.s32.totalorder %s821_s8, %s821_s8 }
  0x4b   :  { %632 = vmatpush3.bf16.msra.mxu1 %v700_v7 }
  0x4c   :  { %633 = vmatprep.subr.bf16.mxu1 %v856_v0  ;;  %648 = vmatpush3.bf16.msra.mxu0 %v706_v13  ;;  %p828_p0 = por %p827_p13, %p826_p12 }
  0x4d   :  { %649 = vmatprep.subr.bf16.mxu0 %v856_v0 }
  0x4e   :  { %p829_p1 = pnand %p828_p0, %p822_p11 }
  0x4f   :  { %634 = vmatpush3.bf16.msra.mxu1 %v701_v8 }
  0x50   :  { %635 = vmatprep.subr.bf16.mxu1 %v856_v0  ;;  %650 = vmatpush3.bf16.msra.mxu0 %v707_v14 }
  0x51   :  { %651 = vmatprep.subr.bf16.mxu0 %v856_v0 }
  0x53   :  { %636 = vmatpush3.bf16.msra.mxu1 %v702_v9 }
  0x54   :  { %637 = vmatprep.subr.bf16.mxu1 %v856_v0  ;;  %652 = vmatpush3.bf16.msra.mxu0 %v708_v15 }
  0x55   :  { %653 = vmatprep.subr.bf16.mxu0 %v856_v0 }
  0x57   :  { %638 = vmatpush3.bf16.msra.mxu1 %v703_v10 }
  0x58   :  { %639 = vmatprep.subr.bf16.mxu1 %v856_v0  ;;  %654 = vmatpush3.bf16.msra.mxu0 %v709_v16 }
  0x59   :  { %655 = vmatprep.subr.bf16.mxu0 %v856_v0 }
  0x5b   :  { %640 = vmatpush3.bf16.msra.mxu1 %v704_v11 }
  0x5c   :  { %665 = vmatprep.subr.bf16.mxu1 %v856_v0  ;;  %656 = vmatpush3.bf16.msra.mxu0 %v710_v17 }
  0x5d   :  { %657 = vmatprep.subr.bf16.mxu0 %v856_v0 }
  0x60   :  { %658 = vmatpush3.bf16.msra.mxu0 %v711_v32 }
  0x61   :  { %659 = vmatprep.subr.bf16.mxu0 %v856_v0 }
  0x64   :  { %660 = vmatpush3.bf16.msra.mxu0 %v712_v33 }
 0x106   :  { %v168_v19 = vpop.f32.mrf.mxu0 }
 0x107   :  { %v169_v21 = vadd.f32 %v554_v18, %v168_v19 }
 0x108   :  { %v623_v23 = vpop.f32.mrf.mxu0 }
 0x109   :  { %v181_v24 = vmul.f32 %v558_v20, %v169_v21  ;;  %v190_v25 = vpack.c.bf16 %v169_v21, %v169_v21 }
 0x10a   :  { %v171_v26 = vpop.f32.mrf.mxu0 }
 0x10b   :  { %v189_v27 = vadd.f32 %v559_v22, %v181_v24  ;;  %191 = vst [vmem:[#allocation11] sm:$0xf] %v190_v25 }
 0x10c   :  { %v624_v28 = vpop.f32.mrf.mxu0 }
 0x10d   :  { %vm192_vm2 = vcmp.gt.f32.partialorder %v189_v27, 0.0  ;;  %v193_v29 = vmul.f32 0.01, %v189_v27 }
 0x10f   :  { %v194_v30 = vsel %vm192_vm2, %v189_v27, %v193_v29 }
 0x110   :  { %v195_v31 = vpack.c.bf16 %v194_v30, %v194_v30 }
 0x112   :  { %642 = vmatmul.mubr.bf16.vlgmr.msra.gmra.mxu1 %v195_v31  ;;  %v533_v63 = vld [vmem:[#allocation11] sm:$0xf] }
 0x113   :  { %681 = vmatprep.mubr.msk.bf16.mxu1 %vm857_vm0, %v856_v0  ;;  %666 = vmatpush3.bf16.msra.mxu1 %v713_v34 }
 0x114   :  { %667 = vmatprep.subr.bf16.mxu1 %v856_v0 }
 0x117   :  { %668 = vmatpush3.bf16.msra.mxu1 %v714_v35 }
 0x118   :  { %669 = vmatprep.subr.bf16.mxu1 %v856_v0 }
 0x11b   :  { %670 = vmatpush3.bf16.msra.mxu1 %v715_v36 }
 0x11c   :  { %671 = vmatprep.subr.bf16.mxu1 %v856_v0 }
 0x11f   :  { %672 = vmatpush3.bf16.msra.mxu1 %v716_v37 }
 0x120   :  { %673 = vmatprep.subr.bf16.mxu1 %v856_v0 }
 0x123   :  { %674 = vmatpush3.bf16.msra.mxu1 %v717_v38 }
 0x124   :  { %675 = vmatprep.subr.bf16.mxu1 %v856_v0 }
 0x127   :  { %676 = vmatpush3.bf16.msra.mxu1 %v718_v39 }
 0x128   :  { %677 = vmatprep.subr.bf16.mxu1 %v856_v0 }
 0x12b   :  { %678 = vmatpush3.bf16.msra.mxu1 %v719_v48 }
 0x12c   :  { %679 = vmatprep.subr.bf16.mxu1 %v856_v0 }
 0x12f   :  { %680 = vmatpush3.bf16.msra.mxu1 %v720_v49 }
 0x1d2   :  { %v301_v41 = vpop.f32.mrf.mxu1 }
 0x1d3   :  { %v302_v42 = vadd.f32 %v560_v40, %v301_v41 }
 0x1d4   :  { %v643_v43 = vpop.f32.mrf.mxu1 }
 0x1d5   :  { %v307_v44 = vmax.f32 %v302_v42, 0.0 }
 0x1d6   :  { %v304_v45 = vpop.f32.mrf.mxu1 }
 0x1d7   :  { %v308_v46 = vpack.c.bf16 %v307_v44, %v307_v44 }
 0x1d8   :  { %v644_v47 = vpop.f32.mrf.mxu1 }
 0x1d9   :  { %662 = vmatmul.mubr.bf16.vlgmr.msra.gmra.mxu0 %v308_v46 }
 0x299   :  { %v414_v51 = vpop.f32.mrf.mxu0 }
 0x29a   :  { %v415_v52 = vadd.f32 %v569_v50, %v414_v51 }
 0x29b   :  { %v663_v53 = vpop.f32.mrf.mxu0 }
 0x29c   :  { %v420_v54 = vmax.f32 %v415_v52, 0.0 }
 0x29d   :  { %v417_v55 = vpop.f32.mrf.mxu0 }
 0x29e   :  { %v421_v56 = vpack.c.bf16 %v420_v54, %v420_v54 }
 0x29f   :  { %v664_v57 = vpop.f32.mrf.mxu0 }
 0x2a0   :  { %682 = vmatmul.mubr.bf16.vlgmr.msra.gmra.mxu1 %v421_v56 }
 0x360   :  { %v527_v59 = vpop.f32.mrf.mxu1 }
 0x361   :  { %v528_v60 = vadd.f32 %v578_v58, %v527_v59 }
 0x362   :  { %v683_v61 = vpop.f32.mrf.mxu1 }
 0x363   :  { %v534_v62 = vpack.c.bf16 %v528_v60, %v528_v60 }
 0x364   :  { %v530_v0 = vpop.f32.mrf.mxu1 }
 0x365   :  { %v535_v1 = vadd.bf16 %v534_v62, %v533_v63 }
 0x366   :  { %v684_v2 = vpop.f32.mrf.mxu1 }
 0x367   :  { %536 = vst [vmem:[#allocation11] sm:$0xf] %v535_v1 }
 0x368   :  { %832 = shalt.err (!%p829_p1)
}
 0x369   :  { %546 = dma.vmem_to_hbm [thread:$0]  %s544_s29, 64, %s1012_s11, [#allocation4]  }
 0x36a   :  { %847 = dma.done.wait [#allocation4], 64  }
 0x36b   :  { %848 = vsyncadd [#allocation4], 4294967232 }
 0x36c   :  { %550 = vsyncpa [#allocation3], 1 }
 0x36d   :  { %551 = vsyncpa [#allocation6], 1 }
 0x36e   :  { %552 = vsyncpa [#allocation9], 1 }
 0x36f   :  { %553 = vsyncpa [#allocation4], 1 }

</bundles_post_ra>
